<compile_context>
chip_gen: v7x
topology: tpu7x:2x2x1
jax: 0.10.0
libtpu: 0.0.40
codegen_flags: <defaults>
</compile_context>

<pallas_src>
from functools import partial

import jax
import jax.numpy as jnp
from jax.experimental import pallas as pl
from jax.experimental.pallas import tpu as pltpu


def _round_up(x, m):
    return (x + m - 1) // m * m


def _vmem_capacity_bytes():
    try:
        return int(pltpu.get_tpu_info().vmem_capacity_bytes)
    except Exception:
        return 64 << 20  # conservative fallback: v7x physical VMEM


def _single_buffered_spec(block_shape, index_map):
    """Weight/bias spec: block index is constant along the inner row axis, so one VMEM buffer
    is enough (DMA exposed at most once per column tile, amortized over all row tiles)."""
    if hasattr(pl, "Buffered"):
        try:
            return pl.BlockSpec(block_shape, index_map, pipeline_mode=pl.Buffered(1))
        except TypeError:
            pass
    return pl.BlockSpec(block_shape, index_map)


def _glu_kernel(x_ref, wv_ref, wg_ref, bv_ref, bg_ref, o_ref, *, variation, compute_dtype):
    # x_ref : (tm, dim)      activation row tile (original dtype, cast here, not in the wrapper)
    # wv/wg : (dim, tn)      value / gate weight slabs (compute dtype, e.g. bf16)
    # bv/bg : (1, tn) f32    matching bias slabs
    # o_ref : (tm, tn)       lane-dense output tile
    x = x_ref[...]
    if compute_dtype is not None and x.dtype != jnp.dtype(compute_dtype):
        x = x.astype(compute_dtype)  # VPU cast, hidden under the MXU
    value = jnp.dot(x, wv_ref[...], preferred_element_type=jnp.float32) + bv_ref[...]
    gate = jnp.dot(x, wg_ref[...], preferred_element_type=jnp.float32) + bg_ref[...]
    o_ref[...] = (variation(gate) * value).astype(o_ref.dtype)


def prepare_glu_params(W, b=None, *, compute_dtype=jnp.bfloat16):
    """One-time (model-load-time) parameter preparation.

    W : [2*dim, dim]  nn.Linear(dim, 2*dim) weight (value rows first, gate rows second).
    b : [2*dim] or None.
    Returns (Wv, Wg, bv, bg): (dim, dim_p) weights stored in `compute_dtype` (bf16 default,
    halving weight HBM traffic) and (1, dim_p) float32 biases. dim_p = round_up(dim, 128) so
    value/gate output tiles are always lane-dense; padded columns are zero and sliced off.
    """
    two_dim, dim = W.shape
    assert two_dim == 2 * dim, "expected nn.Linear(dim, 2*dim) weight layout"
    dim_p = _round_up(dim, 128)
    w_dtype = compute_dtype if compute_dtype is not None else W.dtype

    Wv = jnp.transpose(W[:dim, :])  # (dim, dim)  value projection
    Wg = jnp.transpose(W[dim:, :])  # (dim, dim)  gate projection
    if dim_p != dim:
        pad = ((0, 0), (0, dim_p - dim))
        Wv = jnp.pad(Wv, pad)
        Wg = jnp.pad(Wg, pad)
    Wv = Wv.astype(w_dtype)
    Wg = Wg.astype(w_dtype)

    if b is None:
        bv = jnp.zeros((1, dim_p), jnp.float32)
        bg = jnp.zeros((1, dim_p), jnp.float32)
    else:
        bv = jnp.zeros((1, dim_p), jnp.float32).at[0, :dim].set(b[:dim].astype(jnp.float32))
        bg = jnp.zeros((1, dim_p), jnp.float32).at[0, :dim].set(b[dim:].astype(jnp.float32))
    return Wv, Wg, bv, bg


def _choose_tiles(dim, dim_p, tm_req, w_bytes, x_bytes, out_bytes, align, single_buf_w):
    cap = _vmem_capacity_bytes()
    budget = int(cap * 0.85)  # ~108 MiB on v5e/v6e (128 MiB VMEM), ~54 MiB on v7x (64 MiB)
    wbuf = 1 if single_buf_w else 2

    def footprint(tm, tn):
        weights = 2 * wbuf * dim * tn * w_bytes        # Wv + Wg slabs
        biases = 2 * wbuf * tn * 4
        x_in = 2 * tm * dim * x_bytes                  # double-buffered activation tile
        out = 2 * tm * tn * out_bytes                  # double-buffered output tile
        inter = tm * dim * w_bytes + 3 * tm * tn * 4   # in-kernel cast + f32 value/gate temps
        return weights + biases + x_in + out + inter

    tm_opts = []
    t = max(_round_up(tm_req, align), align)
    while t >= align:
        tm_opts.append(t)
        t //= 2
    tn_opts = [dim_p] + [t for t in (2048, 1024, 512, 256, 128) if t < dim_p and dim_p % t == 0]

    # Prefer full weight residency (x read from HBM exactly once), then the largest row tile.
    for tn in tn_opts:
        for tm in tm_opts:
            fp = footprint(tm, tn)
            if fp <= budget:
                return tm, tn, fp, cap
    tm, tn = tm_opts[-1], tn_opts[-1]
    return tm, tn, footprint(tm, tn), cap


def glu_pallas(x, Wv, Wg, bv, bg, *, variation=jax.nn.sigmoid, tm=512, compute_dtype=None):
    """GLU forward: variation(x @ Wg + bg) * (x @ Wv + bv), params from prepare_glu_params."""
    orig_shape = x.shape
    dim = orig_shape[-1]
    dim_p = Wv.shape[1]
    assert Wv.shape == (dim, dim_p) and Wg.shape == (dim, dim_p)
    assert bv.shape == (1, dim_p) and bg.shape == (1, dim_p)

    cdtype = jnp.dtype(compute_dtype) if compute_dtype is not None else jnp.dtype(Wv.dtype)
    out_dtype = x.dtype
    x2d = x.reshape(-1, dim)          # no wrapper-side pad or cast (both done in-kernel / by grid)
    N = x2d.shape[0]

    x_bytes = jnp.dtype(x.dtype).itemsize
    w_bytes = jnp.dtype(Wv.dtype).itemsize
    out_bytes = jnp.dtype(out_dtype).itemsize
    # Native sublane tile is 32 bytes deep: 8 rows for f32, 16 for bf16, 32 for 1-byte dtypes.
    align = max(32 // min(x_bytes, w_bytes, cdtype.itemsize), 8)

    single_buf_w = hasattr(pl, "Buffered")
    tm_sel, tn, fp, cap = _choose_tiles(dim, dim_p, tm, w_bytes, x_bytes, out_bytes,
                                        align, single_buf_w)
    # Largest align-multiple row tile that is <= N (ragged tail -> Pallas partial last block).
    tm_cap = (N // align) * align if N >= align else align
    tm_eff = min(tm_sel, tm_cap)
    ni = pl.cdiv(N, tm_eff)
    nj = dim_p // tn

    vmem_limit = int(min(max(fp + (8 << 20), 32 << 20), cap - (4 << 20)))

    kern = partial(_glu_kernel, variation=variation, compute_dtype=cdtype)

    if nj == 1:
        # Full weight residency: 1-D grid over row tiles; long 'parallel' axis splits evenly
        # across v7x's two TensorCores and x is streamed from HBM exactly once.
        grid = (ni,)
        in_specs = [
            pl.BlockSpec((tm_eff, dim), lambda i: (i, 0)),
            _single_buffered_spec((dim, tn), lambda i: (0, 0)),
            _single_buffered_spec((dim, tn), lambda i: (0, 0)),
            _single_buffered_spec((1, tn), lambda i: (0, 0)),
            _single_buffered_spec((1, tn), lambda i: (0, 0)),
        ]
        out_specs = pl.BlockSpec((tm_eff, tn), lambda i: (i, 0))
        dim_sem = ("parallel",)
    else:
        # Column axis OUTER / 'arbitrary': each weight slab is DMA'd once per column tile and
        # reused across all row tiles; the long row axis stays 'parallel' for megacore splitting.
        grid = (nj, ni)
        in_specs = [
            pl.BlockSpec((tm_eff, dim), lambda j, i: (i, 0)),
            _single_buffered_spec((dim, tn), lambda j, i: (0, j)),
            _single_buffered_spec((dim, tn), lambda j, i: (0, j)),
            _single_buffered_spec((1, tn), lambda j, i: (0, j)),
            _single_buffered_spec((1, tn), lambda j, i: (0, j)),
        ]
        out_specs = pl.BlockSpec((tm_eff, tn), lambda j, i: (i, j))
        dim_sem = ("arbitrary", "parallel")

    out2d = pl.pallas_call(
        kern,
        out_shape=jax.ShapeDtypeStruct((N, dim_p), out_dtype),
        grid_spec=pltpu.PrefetchScalarGridSpec(
            num_scalar_prefetch=0,
            grid=grid,
            in_specs=in_specs,
            out_specs=out_specs,
        ),
        compiler_params=pltpu.CompilerParams(
            dimension_semantics=dim_sem,
            vmem_limit_bytes=vmem_limit,
        ),
    )(x2d, Wv, Wg, bv, bg)

    if dim_p != dim:
        out2d = out2d[:, :dim]
    return out2d.reshape(orig_shape)


def glu_reference(x, W, b, variation=jax.nn.sigmoid, compute_dtype=None):
    """Pure-JAX reference. compute_dtype casts the matmul operands (f32 accumulation)."""
    dim = x.shape[-1]
    xx, Wx = x, W
    if compute_dtype is not None:
        xx = x.astype(compute_dtype)
        Wx = W.astype(compute_dtype)
    proj = jnp.einsum("...d,od->...o", xx, Wx, preferred_element_type=jnp.float32)
    if b is not None:
        proj = proj + b.astype(jnp.float32)
    value, gate = proj[..., :dim], proj[..., dim:]
    return (variation(gate) * value).astype(x.dtype)


if __name__ == "__main__":
    key = jax.random.PRNGKey(0)
    batch, seq, dim = 2, 8, 128  # small, lane-aligned feature dim

    kx, kw, kb = jax.random.split(key, 3)
    x = jax.random.normal(kx, (batch, seq, dim), dtype=jnp.float32)
    bound = 1.0 / (dim ** 0.5)  # synthetic nn.Linear(dim, 2*dim) default-style init
    W = jax.random.uniform(kw, (2 * dim, dim), jnp.float32, -bound, bound)
    b = jax.random.uniform(kb, (2 * dim,), jnp.float32, -bound, bound)

    # Hoisted, one-time parameter prep (bf16 storage/compute: MXU-native on v5e/v6e/v7x).
    Wv, Wg, bv, bg = prepare_glu_params(W, b, compute_dtype=jnp.bfloat16)

    # TODO(synk): arbitrary torch `variation` nn.Modules are supported only as JAX-traceable
    # elementwise callables passed via `variation=` (default sigmoid, matching the module default).
    out = glu_pallas(x, Wv, Wg, bv, bg, variation=jax.nn.sigmoid)
    out = jax.block_until_ready(out)
    assert out.shape == x.shape

    # Tight check against a reference using the same bf16 operands (f32 accumulation) ...
    ref_bf16 = glu_reference(x, W, b, compute_dtype=jnp.bfloat16)
    assert jnp.allclose(out, ref_bf16, atol=2e-3, rtol=2e-3), "mismatch vs bf16-operand reference"
    # ... and a loose check against the full-f32 reference (bf16 operand rounding only).
    ref_f32 = glu_reference(x, W, b)
    assert jnp.allclose(out, ref_f32, atol=5e-2, rtol=5e-2), "mismatch vs f32 reference"

    # Ragged row count (N = 21, not a multiple of the row tile): exercises the Pallas partial
    # last block instead of a wrapper-side jnp.pad.
    x2 = jax.random.normal(jax.random.PRNGKey(1), (3, 7, dim), dtype=jnp.float32)
    out2 = jax.block_until_ready(glu_pallas(x2, Wv, Wg, bv, bg))
    assert out2.shape == x2.shape
    ref2 = glu_reference(x2, W, b, compute_dtype=jnp.bfloat16)
    assert jnp.allclose(out2, ref2, atol=2e-3, rtol=2e-3), "mismatch on ragged rows"

    print("KERNEL_OK")
</pallas_src>

<mosaic_0001>
module attributes {stable_mosaic.version = 11 : i64} {
  func.func @_glu_kernel(%arg0: i32, %arg1: memref<16x128xf32, #tpu.memory_space<vmem>>, %arg2: memref<128x128xbf16, #tpu.memory_space<vmem>>, %arg3: memref<128x128xbf16, #tpu.memory_space<vmem>>, %arg4: memref<1x128xf32, #tpu.memory_space<vmem>>, %arg5: memref<1x128xf32, #tpu.memory_space<vmem>>, %arg6: memref<16x128xf32, #tpu.memory_space<vmem>>) attributes {dimension_semantics = [#tpu.dimension_semantics<parallel>], iteration_bounds = array<i64: 1>, scalar_prefetch = 0 : i64, scratch_operands = 0 : i64, tpu.core_type = #tpu.core_type<tc>, window_params = [{transform_indices = @transform_0, window_bounds = array<i64: 16, 128>}, {pipeline_mode = #tpu.pipeline_mode<synchronous>, transform_indices = @transform_1, window_bounds = array<i64: 128, 128>}, {pipeline_mode = #tpu.pipeline_mode<synchronous>, transform_indices = @transform_2, window_bounds = array<i64: 128, 128>}, {pipeline_mode = #tpu.pipeline_mode<synchronous>, transform_indices = @transform_3, window_bounds = array<i64: 1, 128>}, {pipeline_mode = #tpu.pipeline_mode<synchronous>, transform_indices = @transform_4, window_bounds = array<i64: 1, 128>}, {transform_indices = @transform_5, window_bounds = array<i64: 16, 128>}]} {
    %c0 = arith.constant 0 : index
    %c0_0 = arith.constant 0 : index
    %0 = vector.load %arg1[%c0, %c0_0] : memref<16x128xf32, #tpu.memory_space<vmem>>, vector<16x128xf32>
    %1 = arith.truncf %0 : vector<16x128xf32> to vector<16x128xbf16>
    %c0_1 = arith.constant 0 : index
    %c0_2 = arith.constant 0 : index
    %2 = vector.load %arg2[%c0_1, %c0_2] : memref<128x128xbf16, #tpu.memory_space<vmem>>, vector<128x128xbf16>
    %cst = arith.constant dense<0.000000e+00> : vector<16x128xf32>
    %3 = tpu.matmul %1, %2, %cst {dimension_numbers = #tpu.dot_dimension_numbers<[1], [0], [0], [1], [0, 0, 1, 1], [], []>} : vector<16x128xbf16>, vector<128x128xbf16>, vector<16x128xf32> -> vector<16x128xf32>
    %c0_3 = arith.constant 0 : index
    %c0_4 = arith.constant 0 : index
    %4 = vector.load %arg4[%c0_3, %c0_4] : memref<1x128xf32, #tpu.memory_space<vmem>>, vector<1x128xf32>
    %5 = vector.broadcast %4 : vector<1x128xf32> to vector<16x128xf32>
    %6 = arith.addf %3, %5 : vector<16x128xf32>
    %c0_5 = arith.constant 0 : index
    %c0_6 = arith.constant 0 : index
    %7 = vector.load %arg3[%c0_5, %c0_6] : memref<128x128xbf16, #tpu.memory_space<vmem>>, vector<128x128xbf16>
    %cst_7 = arith.constant dense<0.000000e+00> : vector<16x128xf32>
    %8 = tpu.matmul %1, %7, %cst_7 {dimension_numbers = #tpu.dot_dimension_numbers<[1], [0], [0], [1], [0, 0, 1, 1], [], []>} : vector<16x128xbf16>, vector<128x128xbf16>, vector<16x128xf32> -> vector<16x128xf32>
    %c0_8 = arith.constant 0 : index
    %c0_9 = arith.constant 0 : index
    %9 = vector.load %arg5[%c0_8, %c0_9] : memref<1x128xf32, #tpu.memory_space<vmem>>, vector<1x128xf32>
    %10 = vector.broadcast %9 : vector<1x128xf32> to vector<16x128xf32>
    %11 = arith.addf %8, %10 : vector<16x128xf32>
    %12 = arith.negf %11 : vector<16x128xf32>
    %13 = math.exp %12 : vector<16x128xf32>
    %cst_10 = arith.constant 1.000000e+00 : f32
    %14 = vector.broadcast %cst_10 : f32 to vector<16x128xf32>
    %15 = arith.addf %14, %13 : vector<16x128xf32>
    %16 = arith.divf %14, %15 : vector<16x128xf32>
    %17 = arith.mulf %16, %6 : vector<16x128xf32>
    %c0_11 = arith.constant 0 : index
    %c0_12 = arith.constant 0 : index
    %18 = vector.load %arg6[%c0_11, %c0_12] : memref<16x128xf32, #tpu.memory_space<vmem>>, vector<16x128xf32>
    tpu.vector_store %arg6[%c0_11, %c0_12], %17 {strides = array<i32>} : memref<16x128xf32, #tpu.memory_space<vmem>>, vector<16x128xf32>,
    return
  }
  func.func @transform_0(%arg0: i32) -> (i32, i32) {
    %c0_i32 = arith.constant 0 : i32
    %c0_i32_0 = arith.constant 0 : i32
    return %arg0, %c0_i32 : i32, i32
  }
  func.func @transform_1(%arg0: i32) -> (i32, i32) {
    %c0_i32 = arith.constant 0 : i32
    %c0_i32_0 = arith.constant 0 : i32
    %c0_i32_1 = arith.constant 0 : i32
    return %c0_i32, %c0_i32_0 : i32, i32
  }
  func.func @transform_2(%arg0: i32) -> (i32, i32) {
    %c0_i32 = arith.constant 0 : i32
    %c0_i32_0 = arith.constant 0 : i32
    %c0_i32_1 = arith.constant 0 : i32
    return %c0_i32, %c0_i32_0 : i32, i32
  }
  func.func @transform_3(%arg0: i32) -> (i32, i32) {
    %c0_i32 = arith.constant 0 : i32
    %c0_i32_0 = arith.constant 0 : i32
    %c0_i32_1 = arith.constant 0 : i32
    return %c0_i32, %c0_i32_0 : i32, i32
  }
  func.func @transform_4(%arg0: i32) -> (i32, i32) {
    %c0_i32 = arith.constant 0 : i32
    %c0_i32_0 = arith.constant 0 : i32
    %c0_i32_1 = arith.constant 0 : i32
    return %c0_i32, %c0_i32_0 : i32, i32
  }
  func.func @transform_5(%arg0: i32) -> (i32, i32) {
    %c0_i32 = arith.constant 0 : i32
    %c0_i32_0 = arith.constant 0 : i32
    return %arg0, %c0_i32 : i32, i32
  }
}

</mosaic_0001>

<bundles_post_ra>
// kernel: tpu_custom_call.1
= control target key start
LH: loop header
LB: loop body
LE: loop exit
PB: predicated region body
PF: predicated region fallthrough
CT: control target
= control target key end

     0   :  { %10 = vsyncpa [#allocation3], 0  ;;  %s636_s0 = inlined_call_operand.hbm [shape: f32[16,128], index: 0, kind: input, shape index: {}]   ;;  %s637_s1 = inlined_call_operand.hbm [shape: bf16[128,128], index: 1, kind: input, shape index: {}]   ;;  %s638_s2 = inlined_call_operand.hbm [shape: bf16[128,128], index: 2, kind: input, shape index: {}]   ;;  %s639_s3 = inlined_call_operand.vmem [shape: f32[1,128], index: 3, kind: input, shape index: {}]   ;;  %s640_s4 = inlined_call_operand.vmem [shape: f32[1,128], index: 4, kind: input, shape index: {}]   ;;  %s641_s5 = inlined_call_operand.hbm [shape: f32[16,128], index: 5, kind: output, shape index: {}]  }
   0x1   :  { %11 = vsyncpa [#allocation6], 0 }
   0x2   :  { %12 = vsyncpa [#allocation4], 0  ;;  %s530_s18 = smov [#allocation5]   ;;  %s436_s22 = scalar_lea.hbm %s637_s1, 1024 }
   0x3   :  { %s30_s19 = sshll.u32 %s530_s18, 4  ;;  %p437_p0 = scmp.ne.s32.totalorder %s637_s1, %s436_s22  ;;  %s31_s19 = int_to_ptr.vmem [resolvable:$true] %s30_s19 }
   0x4   :  { %p440_p1 = scmp.lt.u32.totalorder %s436_s22, %s637_s1 }
   0x6   :  { %p442_p2 = pnand %p440_p1, %p437_p0 }
   0x8   :  { %445 = shalt.err (!%p442_p2)
}
   0x9   :  { %s446_s27 = scalar_lea.vmem %s31_s19, 1024  ;;  %p451_p4 = scmp.lt.s32.totalorder %s31_s19, %s31_s19 }
   0xa   :  { %p447_p3 = scmp.ne.s32.totalorder %s31_s19, %s446_s27  ;;  %p452_p5 = scmp.lt.s32.totalorder %s446_s27, %s446_s27 }
   0xc   :  { %p453_p6 = por %p452_p5, %p451_p4 }
   0xe   :  { %p454_p7 = pnand %p453_p6, %p447_p3 }
  0x10   :  { %457 = shalt.err (!%p454_p7)
}
  0x11   :  { %s531_s28 = smov 64   ;;  %s532_s29 = smov 4  }
  0x12   :  { %36 = dma.hbm_to_vmem [thread:$0]  %s637_s1, 1024, %s31_s19, [#allocation6], %s531_s28, %s531_s28, %s532_s29  }
  0x13   :  { %s533_s7 = smov [#allocation2]   ;;  %s458_s11 = scalar_lea.hbm %s636_s0, 256 }
  0x14   :  { %s18_s8 = sshll.u32 %s533_s7, 4  ;;  %p459_p8 = scmp.ne.s32.totalorder %s636_s0, %s458_s11  ;;  %s19_s8 = int_to_ptr.vmem [resolvable:$true] %s18_s8 }
  0x15   :  { %p462_p9 = scmp.lt.u32.totalorder %s458_s11, %s636_s0 }
  0x17   :  { %p464_p10 = pnand %p462_p9, %p459_p8 }
  0x19   :  { %467 = shalt.err (!%p464_p10)
}
  0x1a   :  { %s468_s16 = scalar_lea.vmem %s19_s8, 256  ;;  %p473_p12 = scmp.lt.s32.totalorder %s19_s8, %s19_s8 }
  0x1b   :  { %p469_p11 = scmp.ne.s32.totalorder %s19_s8, %s468_s16  ;;  %p474_p13 = scmp.lt.s32.totalorder %s468_s16, %s468_s16 }
  0x1d   :  { %p475_p0 = por %p474_p13, %p473_p12 }
  0x1f   :  { %p476_p1 = pnand %p475_p0, %p469_p11 }
  0x21   :  { %479 = shalt.err (!%p476_p1)
}
  0x22   :  { %s534_s1 = smov 128   ;;  %s535_s17 = smov 8  }
  0x23   :  { %24 = dma.hbm_to_vmem [thread:$0]  %s636_s0, 256, %s19_s8, [#allocation3], %s534_s1, %s534_s1, %s535_s17  }
  0x24   :  { %s536_s20 = smov [#allocation7]   ;;  %s480_s24 = scalar_lea.hbm %s638_s2, 1024 }
  0x25   :  { %s42_s21 = sshll.u32 %s536_s20, 4  ;;  %p481_p2 = scmp.ne.s32.totalorder %s638_s2, %s480_s24  ;;  %s43_s21 = int_to_ptr.vmem [resolvable:$true] %s42_s21 }
  0x26   :  { %p484_p3 = scmp.lt.u32.totalorder %s480_s24, %s638_s2 }
  0x28   :  { %p486_p4 = pnand %p484_p3, %p481_p2 }
  0x2a   :  { %489 = shalt.err (!%p486_p4)
}
  0x2b   :  { %s490_s6 = scalar_lea.vmem %s43_s21, 1024  ;;  %p495_p6 = scmp.lt.s32.totalorder %s43_s21, %s43_s21 }
  0x2c   :  { %p491_p5 = scmp.ne.s32.totalorder %s43_s21, %s490_s6  ;;  %p496_p7 = scmp.lt.s32.totalorder %s490_s6, %s490_s6 }
  0x2e   :  { %p497_p8 = por %p496_p7, %p495_p6 }
  0x30   :  { %p498_p9 = pnand %p497_p8, %p491_p5 }
  0x32   :  { %501 = shalt.err (!%p498_p9)
}
  0x33   :  { %48 = dma.hbm_to_vmem [thread:$0]  %s638_s2, 1024, %s43_s21, [#allocation6], %s531_s28, %s531_s28, %s532_s29  }
  0x34   :  { %524 = dma.done.wait [#allocation3], 256  }
  0x35   :  { %525 = vsyncadd [#allocation3], 4294967040 }
  0x36   :  { %526 = dma.done.wait [#allocation6], 2048  }
  0x37   :  { %527 = vsyncadd [#allocation6], 4294965248  ;;  %v537_v0 = vmov 0.0   ;;  %vm538_vm0 = vmmov 0   ;;  %v412_v1 = vld [vmem:[#allocation7] sm:$0xff]   ;;  %v413_v2 = vld [vmem:[#allocation7 + $0x8] sm:$0xff]  }
  0x38   :  { %382 = vmatprep.subr.bf16.mxu1 %v537_v0  ;;  %362 = vmatprep.subr.bf16.mxu0 %v537_v0  ;;  %v414_v3 = vld [vmem:[#allocation7 + $0x10] sm:$0xff]   ;;  %v418_v4 = vld [vmem:[#allocation5] sm:$0xff]   ;;  %v420_v5 = vld [vmem:[#allocation5 + $0x8] sm:$0xff]   ;;  %s539_s8 = smov [#allocation8]  }
  0x39   :  { %398 = vmatprep.mubr.msk.bf16.mxu1 %vm538_vm0, %v537_v0  ;;  %378 = vmatprep.mubr.msk.bf16.mxu0 %vm538_vm0, %v537_v0  ;;  %v415_v6 = vld [vmem:[#allocation7 + $0x18] sm:$0xff]   ;;  %v422_v7 = vld [vmem:[#allocation5 + $0x10] sm:$0xff]   ;;  %v416_v8 = vld [vmem:[#allocation7 + $0x20] sm:$0xff]   ;;  %s311_s9 = sshll.u32 %s539_s8, 4  ;;  %s312_s9 = int_to_ptr.vmem [resolvable:$true] %s311_s9 }
  0x3a   :  { %383 = vmatpush3.bf16.msra.mxu1 %v412_v1  ;;  %363 = vmatpush3.bf16.msra.mxu0 %v418_v4  ;;  %v423_v9 = vld [vmem:[#allocation5 + $0x18] sm:$0xff]   ;;  %v417_v10 = vld [vmem:[#allocation7 + $0x28] sm:$0xff]   ;;  %v424_v11 = vld [vmem:[#allocation5 + $0x20] sm:$0xff]   ;;  %s502_s10 = scalar_lea.vmem %s312_s9, 256  ;;  %p507_p11 = scmp.lt.s32.totalorder %s312_s9, %s312_s9 }
  0x3b   :  { %384 = vmatprep.subr.bf16.mxu1 %v537_v0  ;;  %364 = vmatprep.subr.bf16.mxu0 %v537_v0  ;;  %v419_v12 = vld [vmem:[#allocation7 + $0x30] sm:$0xff]   ;;  %v425_v13 = vld [vmem:[#allocation5 + $0x28] sm:$0xff]   ;;  %v421_v14 = vld [vmem:[#allocation7 + $0x38] sm:$0xff]   ;;  %p503_p10 = scmp.ne.s32.totalorder %s312_s9, %s502_s10  ;;  %p508_p12 = scmp.lt.s32.totalorder %s502_s10, %s502_s10 }
  0x3c   :  { %v63_v15 = vld [vmem:[#allocation2] sm:$0xff]  ;;  %v64_v16 = vld [vmem:[#allocation2 + $0x8] sm:$0xff] }
  0x3d   :  { %v426_v17 = vld [vmem:[#allocation5 + $0x30] sm:$0xff]   ;;  %v65_v18 = vpack.c.bf16 %v64_v16, %v63_v15  ;;  %v427_v19 = vld [vmem:[#allocation5 + $0x38] sm:$0xff]   ;;  %p509_p13 = por %p508_p12, %p507_p11 }
  0x3e   :  { %385 = vmatpush3.bf16.msra.mxu1 %v413_v2  ;;  %365 = vmatpush3.bf16.msra.mxu0 %v420_v5  ;;  %v333_v20 = vld [vmem:[%s640_s4] ss:$0 sm:$0xff] }
  0x3f   :  { %386 = vmatprep.subr.bf16.mxu1 %v537_v0  ;;  %366 = vmatprep.subr.bf16.mxu0 %v537_v0  ;;  %v324_v37 = vld [vmem:[%s639_s3] ss:$0 sm:$0xff]  ;;  %p510_p0 = pnand %p509_p13, %p503_p10 }
  0x42   :  { %387 = vmatpush3.bf16.msra.mxu1 %v414_v3  ;;  %367 = vmatpush3.bf16.msra.mxu0 %v422_v7 }
  0x43   :  { %388 = vmatprep.subr.bf16.mxu1 %v537_v0  ;;  %368 = vmatprep.subr.bf16.mxu0 %v537_v0 }
  0x46   :  { %389 = vmatpush3.bf16.msra.mxu1 %v415_v6  ;;  %369 = vmatpush3.bf16.msra.mxu0 %v423_v9 }
  0x47   :  { %390 = vmatprep.subr.bf16.mxu1 %v537_v0  ;;  %370 = vmatprep.subr.bf16.mxu0 %v537_v0 }
  0x4a   :  { %391 = vmatpush3.bf16.msra.mxu1 %v416_v8  ;;  %371 = vmatpush3.bf16.msra.mxu0 %v424_v11 }
  0x4b   :  { %392 = vmatprep.subr.bf16.mxu1 %v537_v0  ;;  %372 = vmatprep.subr.bf16.mxu0 %v537_v0 }
  0x4e   :  { %393 = vmatpush3.bf16.msra.mxu1 %v417_v10  ;;  %373 = vmatpush3.bf16.msra.mxu0 %v425_v13 }
  0x4f   :  { %394 = vmatprep.subr.bf16.mxu1 %v537_v0  ;;  %374 = vmatprep.subr.bf16.mxu0 %v537_v0 }
  0x52   :  { %395 = vmatpush3.bf16.msra.mxu1 %v419_v12  ;;  %375 = vmatpush3.bf16.msra.mxu0 %v426_v17 }
  0x53   :  { %396 = vmatprep.subr.bf16.mxu1 %v537_v0  ;;  %376 = vmatprep.subr.bf16.mxu0 %v537_v0 }
  0x56   :  { %397 = vmatpush3.bf16.msra.mxu1 %v421_v14  ;;  %377 = vmatpush3.bf16.msra.mxu0 %v427_v19 }
  0x59   :  { %399 = vmatmul.mubr.bf16.vlgmr.msra.gmra.mrb[0].mxu1 %v65_v18  ;;  %379 = vmatmul.mubr.bf16.vlgmr.msra.gmra.mrb[0].mxu0 %v65_v18 }
 0x12c   :  { %v283_v21 = vpop.f32.mrb[0].mxu1  ;;  %v171_v29 = vpop.f32.mrb[0].mxu0 }
 0x12d   :  { %v284_v22 = vadd.f32 %v333_v20, %v283_v21  ;;  %v400_v23 = vpop.f32.mrb[1].mxu1  ;;  %v380_v30 = vpop.f32.mrb[1].mxu0  ;;  %v172_v38 = vadd.f32 %v324_v37, %v171_v29 }
 0x12e   :  { %v286_v24 = vpop.f32.mrb[2].mxu1  ;;  %v174_v31 = vpop.f32.mrb[2].mxu0 }
 0x12f   :  { %v342_v25 = vmul.f32 -1.442695, %v284_v22  ;;  %v287_v26 = vadd.f32 %v333_v20, %v286_v24  ;;  %v401_v27 = vpop.f32.mrb[3].mxu1  ;;  %v381_v32 = vpop.f32.mrb[3].mxu0  ;;  %v175_v41 = vadd.f32 %v324_v37, %v174_v31 }
 0x131   :  { %428 = vpow2.f32 %v342_v25  ;;  %v343_v28 = vmul.f32 -1.442695, %v287_v26 }
 0x133   :  { %430 = vpow2.f32 %v343_v28 }
 0x13b   :  { %v429_v33 = vpop.eup %428 }
 0x13c   :  { %v296_v34 = vadd.f32 1.0, %v429_v33 }
 0x13d   :  { %v431_v35 = vpop.eup %430 }
 0x13e   :  { %432 = vrcp.f32 %v296_v34  ;;  %v297_v36 = vadd.f32 1.0, %v431_v35 }
 0x140   :  { %434 = vrcp.f32 %v297_v36 }
 0x148   :  { %v433_v39 = vpop.eup %432 }
 0x149   :  { %v302_v40 = vmul.f32 %v433_v39, %v172_v38 }
 0x14a   :  { %v435_v42 = vpop.eup %434 }
 0x14b   :  { %304 = vst [vmem:[#allocation8] sm:$0xff] %v302_v40  ;;  %v303_v43 = vmul.f32 %v435_v42, %v175_v41 }
 0x14d   :  { %305 = vst [vmem:[#allocation8 + $0x8] sm:$0xff] %v303_v43 }
 0x14e   :  { %513 = shalt.err (!%p510_p0)
}
 0x14f   :  { %s514_s12 = scalar_lea.hbm %s641_s5, 256 }
 0x150   :  { %p515_p1 = scmp.ne.s32.totalorder %s641_s5, %s514_s12  ;;  %p518_p2 = scmp.lt.u32.totalorder %s514_s12, %s641_s5 }
 0x152   :  { %p520_p3 = pnand %p518_p2, %p515_p1 }
 0x154   :  { %523 = shalt.err (!%p520_p3)
}
 0x155   :  { %317 = dma.vmem_to_hbm [thread:$0]  %s312_s9, 256, %s641_s5, [#allocation4], %s534_s1, %s534_s1, %s535_s17  }
 0x156   :  { %528 = dma.done.wait [#allocation4], 256  }
 0x157   :  { %529 = vsyncadd [#allocation4], 4294967040 }
 0x158   :  { %321 = vsyncpa [#allocation3], 1 }
 0x159   :  { %322 = vsyncpa [#allocation6], 1 }
 0x15a   :  { %323 = vsyncpa [#allocation4], 1 }

</bundles_post_ra>
